<compile_context>
chip_gen: v7x
topology: tpu7x:2x2x1
jax: 0.10.0
libtpu: 0.0.40
codegen_flags: <defaults>
</compile_context>

<pallas_src>
import jax
import jax.numpy as jnp
from jax import lax
from jax.experimental import pallas as pl
from jax.experimental.pallas import tpu as pltpu

EPS = 1e-5  # torch.nn.LayerNorm default


def _conv_ln_kernel(x_ref, gamma_ref, beta_ref, o_ref):
    # x_ref / o_ref: (C, tile_T)  -- C (normalized axis) on sublanes, T on lanes.
    # gamma_ref / beta_ref: (C, 1) -- broadcast across lanes.
    x = x_ref[...].astype(jnp.float32)
    mean = jnp.mean(x, axis=0, keepdims=True)                 # (1, tile_T) XLU sublane reduce
    centered = x - mean
    var = jnp.mean(centered * centered, axis=0, keepdims=True)
    inv = lax.rsqrt(var + EPS)                                # EUP slot
    y = centered * inv
    y = y * gamma_ref[...].astype(jnp.float32) + beta_ref[...].astype(jnp.float32)
    o_ref[...] = y.astype(o_ref.dtype)


def _choose_tile_t(n_feats, T, itemsize, target_block_bytes=4 * 1024 * 1024):
    """Pick the lane tile along T: full T if small, else a multiple of 128
    sized so one block is ~a few MiB (fits double-buffered on all gens)."""
    if T <= 128:
        return T
    max_cols = max(128, target_block_bytes // max(1, n_feats * itemsize))
    tile = min(T, max_cols)
    tile = (tile // 128) * 128
    return max(128, tile)


def conv_ln_forward(x_nct, gamma, beta):
    """LayerNorm over the channel axis of an NCT tensor, computed in NCT layout.

    x_nct: (B, C, T) with C == n_feats. Returns (B, C, T), matching
    transpose(1,2) -> nn.LayerNorm(C) -> transpose(1,2).
    """
    B, C, T = x_nct.shape
    tile_t = _choose_tile_t(C, T, x_nct.dtype.itemsize)
    grid = (B, pl.cdiv(T, tile_t))  # ragged last T block handled by masked stores

    gamma2d = gamma.reshape(C, 1)
    beta2d = beta.reshape(C, 1)

    # None => squeezed batch dim; kernel sees (C, tile_t) blocks.
    x_spec = pl.BlockSpec((None, C, tile_t), lambda b, t: (b, 0, t))
    out_spec = pl.BlockSpec((None, C, tile_t), lambda b, t: (b, 0, t))
    param_spec = pl.BlockSpec((C, 1), lambda b, t: (0, 0))

    return pl.pallas_call(
        _conv_ln_kernel,
        out_shape=jax.ShapeDtypeStruct((B, C, T), x_nct.dtype),
        grid_spec=pltpu.PrefetchScalarGridSpec(
            num_scalar_prefetch=0,
            grid=grid,
            in_specs=[x_spec, param_spec, param_spec],
            out_specs=out_spec,
        ),
        compiler_params=pltpu.CompilerParams(
            # Independent output blocks on both axes -> shard across TCs.
            dimension_semantics=("parallel", "parallel"),
            # Above the v5e 16 MiB / default 32 MiB scoped limits, below v7x's
            # 64 MiB physical; plenty for 2x double-buffered ~4 MiB blocks.
            vmem_limit_bytes=48 * 1024 * 1024,
        ),
    )(x_nct, gamma2d, beta2d)


def conv_ln_reference(x_nct, gamma, beta):
    x = x_nct.astype(jnp.float32)
    mean = jnp.mean(x, axis=1, keepdims=True)
    var = jnp.mean((x - mean) ** 2, axis=1, keepdims=True)
    y = (x - mean) * lax.rsqrt(var + EPS)
    y = y * gamma.reshape(1, -1, 1) + beta.reshape(1, -1, 1)
    return y.astype(x_nct.dtype)


if __name__ == "__main__":
    key = jax.random.PRNGKey(0)
    k_x, k_g, k_b, k_x2 = jax.random.split(key, 4)

    # Small shapes consistent with (B, n_feats, T).
    B, n_feats, T = 2, 32, 16
    x = jax.random.normal(k_x, (B, n_feats, T), dtype=jnp.float32)
    # nn.LayerNorm init is weight=1, bias=0; perturb so the affine part is exercised.
    gamma = 1.0 + 0.1 * jax.random.normal(k_g, (n_feats,), dtype=jnp.float32)
    beta = 0.1 * jax.random.normal(k_b, (n_feats,), dtype=jnp.float32)

    out = jax.block_until_ready(conv_ln_forward(x, gamma, beta))
    ref = conv_ln_reference(x, gamma, beta)
    assert out.shape == (B, n_feats, T)
    assert jnp.allclose(out, ref, atol=1e-5, rtol=1e-5)

    # Second (still small) check: T > 128 with a ragged last block, exercising
    # the cdiv grid, 128-lane tiles and masked edge stores.
    B2, C2, T2 = 2, 48, 200
    x2 = jax.random.normal(k_x2, (B2, C2, T2), dtype=jnp.float32)
    g2 = 1.0 + 0.05 * jnp.arange(C2, dtype=jnp.float32) / C2
    b2 = 0.02 * jnp.arange(C2, dtype=jnp.float32)
    out2 = jax.block_until_ready(conv_ln_forward(x2, g2, b2))
    assert out2.shape == (B2, C2, T2)
    assert jnp.allclose(out2, conv_ln_reference(x2, g2, b2), atol=1e-5, rtol=1e-5)

    print("KERNEL_OK")
</pallas_src>

<mosaic_0001>
module attributes {stable_mosaic.version = 11 : i64} {
  func.func @_conv_ln_kernel(%arg0: i32, %arg1: i32, %arg2: memref<1x32x16xf32, #tpu.memory_space<vmem>>, %arg3: memref<32x1xf32, #tpu.memory_space<vmem>>, %arg4: memref<32x1xf32, #tpu.memory_space<vmem>>, %arg5: memref<1x32x16xf32, #tpu.memory_space<vmem>>) attributes {dimension_semantics = [#tpu.dimension_semantics<parallel>, #tpu.dimension_semantics<parallel>], iteration_bounds = array<i64: 2, 1>, scalar_prefetch = 0 : i64, scratch_operands = 0 : i64, tpu.core_type = #tpu.core_type<tc>, window_params = [{transform_indices = @transform_0, window_bounds = array<i64: 1, 32, 16>}, {pipeline_mode = #tpu.pipeline_mode<synchronous>, transform_indices = @transform_1, window_bounds = array<i64: 32, 1>}, {pipeline_mode = #tpu.pipeline_mode<synchronous>, transform_indices = @transform_2, window_bounds = array<i64: 32, 1>}, {transform_indices = @transform_3, window_bounds = array<i64: 1, 32, 16>}]} {
    %c0 = arith.constant 0 : index
    %c0_0 = arith.constant 0 : index
    %c0_1 = arith.constant 0 : index
    %0 = vector.load %arg2[%c0, %c0_0, %c0_1] : memref<1x32x16xf32, #tpu.memory_space<vmem>>, vector<1x32x16xf32>
    %1 = vector.shape_cast %0 : vector<1x32x16xf32> to vector<32x16xf32>
    %cst = arith.constant dense<0.000000e+00> : vector<16xf32>
    %2 = vector.multi_reduction <add>, %1, %cst [0] : vector<32x16xf32> to vector<16xf32>
    %3 = vector.shape_cast %2 : vector<16xf32> to vector<1x16xf32>
    %cst_2 = arith.constant 3.200000e+01 : f32
    %4 = vector.broadcast %cst_2 : f32 to vector<1x16xf32>
    %5 = arith.divf %3, %4 : vector<1x16xf32>
    %6 = vector.broadcast %5 : vector<1x16xf32> to vector<32x16xf32>
    %7 = arith.subf %1, %6 : vector<32x16xf32>
    %8 = arith.mulf %7, %7 : vector<32x16xf32>
    %cst_3 = arith.constant dense<0.000000e+00> : vector<16xf32>
    %9 = vector.multi_reduction <add>, %8, %cst_3 [0] : vector<32x16xf32> to vector<16xf32>
    %10 = vector.shape_cast %9 : vector<16xf32> to vector<1x16xf32>
    %cst_4 = arith.constant 3.200000e+01 : f32
    %11 = vector.broadcast %cst_4 : f32 to vector<1x16xf32>
    %12 = arith.divf %10, %11 : vector<1x16xf32>
    %cst_5 = arith.constant 9.99999974E-6 : f32
    %13 = vector.broadcast %cst_5 : f32 to vector<1x16xf32>
    %14 = arith.addf %12, %13 : vector<1x16xf32>
    %15 = math.rsqrt %14 : vector<1x16xf32>
    %16 = vector.broadcast %15 : vector<1x16xf32> to vector<32x16xf32>
    %17 = arith.mulf %7, %16 : vector<32x16xf32>
    %c0_6 = arith.constant 0 : index
    %c0_7 = arith.constant 0 : index
    %18 = vector.load %arg3[%c0_6, %c0_7] : memref<32x1xf32, #tpu.memory_space<vmem>>, vector<32x1xf32>
    %19 = vector.broadcast %18 : vector<32x1xf32> to vector<32x16xf32>
    %20 = arith.mulf %17, %19 : vector<32x16xf32>
    %c0_8 = arith.constant 0 : index
    %c0_9 = arith.constant 0 : index
    %21 = vector.load %arg4[%c0_8, %c0_9] : memref<32x1xf32, #tpu.memory_space<vmem>>, vector<32x1xf32>
    %22 = vector.broadcast %21 : vector<32x1xf32> to vector<32x16xf32>
    %23 = arith.addf %20, %22 : vector<32x16xf32>
    %c0_10 = arith.constant 0 : index
    %c0_11 = arith.constant 0 : index
    %c0_12 = arith.constant 0 : index
    %24 = vector.load %arg5[%c0_10, %c0_11, %c0_12] : memref<1x32x16xf32, #tpu.memory_space<vmem>>, vector<1x32x16xf32>
    %25 = vector.shape_cast %24 : vector<1x32x16xf32> to vector<32x16xf32>
    %26 = vector.shape_cast %23 : vector<32x16xf32> to vector<1x32x16xf32>
    tpu.vector_store %arg5[%c0_10, %c0_11, %c0_12], %26 {strides = array<i32>} : memref<1x32x16xf32, #tpu.memory_space<vmem>>, vector<1x32x16xf32>,
    return
  }
  func.func @transform_0(%arg0: i32, %arg1: i32) -> (i32, i32, i32) {
    %c0_i32 = arith.constant 0 : i32
    %c0_i32_0 = arith.constant 0 : i32
    return %arg0, %c0_i32, %arg1 : i32, i32, i32
  }
  func.func @transform_1(%arg0: i32, %arg1: i32) -> (i32, i32) {
    %c0_i32 = arith.constant 0 : i32
    %c0_i32_0 = arith.constant 0 : i32
    %c0_i32_1 = arith.constant 0 : i32
    return %c0_i32, %c0_i32_0 : i32, i32
  }
  func.func @transform_2(%arg0: i32, %arg1: i32) -> (i32, i32) {
    %c0_i32 = arith.constant 0 : i32
    %c0_i32_0 = arith.constant 0 : i32
    %c0_i32_1 = arith.constant 0 : i32
    return %c0_i32, %c0_i32_0 : i32, i32
  }
  func.func @transform_3(%arg0: i32, %arg1: i32) -> (i32, i32, i32) {
    %c0_i32 = arith.constant 0 : i32
    %c0_i32_0 = arith.constant 0 : i32
    return %arg0, %c0_i32, %arg1 : i32, i32, i32
  }
}

</mosaic_0001>

<bundles_post_ra>
// kernel: tpu_custom_call.1
= control target key start
LH: loop header
LB: loop body
LE: loop exit
PB: predicated region body
PF: predicated region fallthrough
CT: control target
= control target key end

     0   :  { %s480_s12 = smov 0   ;;  %s482_s13 = smov 0   ;;  %s556_s0 = inlined_call_operand.vmem [shape: f32[2,32,16], index: 0, kind: input, shape index: {}]   ;;  %s557_s1 = inlined_call_operand.vmem [shape: f32[32,1], index: 1, kind: input, shape index: {}]   ;;  %s558_s2 = inlined_call_operand.vmem [shape: f32[32,1], index: 2, kind: input, shape index: {}]   ;;  %s559_s3 = inlined_call_operand.vmem [shape: f32[2,32,16], index: 3, kind: output, shape index: {}]  }
   0x1   :  { %s484_s14 = smov 0  }
   0x2 LB: > { %s25_s15 = sadd.s32 1, %s453_s13  ;;  %p397_p0 = scmp.ge.s32.totalorder %s457_s14, 1  ;;  %s457_s14 = sphi %s484_s14, %s13_s14   ;;  %s453_s13 = sphi %s482_s13, %s561_s13   ;;  %s449_s12 = sphi %s480_s12, %s560_s12  }
   0x3   : > { %p27_p1 = scmp.ge.s32.totalorder %s25_s15, 2  ;;  %p156_p2 = scmp.lt.s32.totalorder %s457_s14, 3 }
   0x5   : > { %s563_s15 = smov (%p27_p1, %s25_s15), 0  ;;  %p157_p3 = pnand %p397_p0, %p156_p2 }
   0x6   : > { %v252_v0 = vld [vmem:[%s557_s1 + $0x10] sm:$0xff] (!%p157_p3)  ;;  %v250_v1 = vld [vmem:[%s557_s1] sm:$0xff] (!%p157_p3)  ;;  %v459_v2 = vmov (!%p157_p3), 0   ;;  %v253_v3 = vld [vmem:[%s557_s1 + $0x18] sm:$0xff] (!%p157_p3)  ;;  %p186_p4 = scmp.lt.s32.totalorder (!%p157_p3), %s449_s12, 1  ;;  %vm206_vm0 = vcmask (!%p157_p3), 130048  }
   0x7   : > { %160 = sbr.rel (%p157_p3) target bundleno = 151 (0x97), region = 32  ;;  %432 = vset.pattern.permute.xlu1 (!%p157_p3), %v459_v2  ;;  %431 = vset.pattern.permute.xlu0 (!%p157_p3), %v459_v2  ;;  %v251_v4 = vld [vmem:[%s557_s1 + $0x8] sm:$0xff] (!%p157_p3)  ;;  %v278_v6 = vld [vmem:[%s558_s2] sm:$0xff] (!%p157_p3)  ;;  %v281_v7 = vld [vmem:[%s558_s2 + $0x18] sm:$0xff] (!%p157_p3) }
   0x8   : > { %266 = vperm.xlu1 (!%p157_p3), %432, %v252_v0   ;;  %256 = vperm.xlu0 (!%p157_p3), %431, %v250_v1   ;;  %v279_v5 = vld [vmem:[%s558_s2 + $0x8] sm:$0xff] (!%p157_p3)  ;;  %v280_v8 = vld [vmem:[%s558_s2 + $0x10] sm:$0xff] (!%p157_p3) }
   0xc   : > { %271 = vperm.xlu1 (!%p157_p3), %432, %v253_v3   ;;  %261 = vperm.xlu0 (!%p157_p3), %431, %v251_v4  }
   0xe   : > { %s565_s12 = smov (!%p186_p4, %s449_s12), 1 }
   0xf   : > { %s404_s5 = sshll.u32 %s565_s12, 5 }
  0x10   : > { %289 = vperm.xlu1 %432, %v279_v5   ;;  %284 = vperm.xlu0 %431, %v278_v6   ;;  %s193_s8 = scalar_lea.vmem %s556_s0, %s404_s5  ;;  %s201_s11 = scalar_lea.vmem %s559_s3, %s404_s5 }
  0x11   : > { %v202_v9 = vld [vmem:[%s193_s8] sm:$0xff]  ;;  %v203_v10 = vld [vmem:[%s193_s8 + $0x8] sm:$0xff]  ;;  %v204_v13 = vld [vmem:[%s193_s8 + $0x10] sm:$0xff] }
  0x12   : > { %v207_v11 = vsel %vm206_vm0, %v202_v9, 0.0  ;;  %v208_v12 = vsel %vm206_vm0, %v203_v10, 0.0  ;;  %v210_v15 = vsel %vm206_vm0, %v204_v13, 0.0  ;;  %v205_v16 = vld [vmem:[%s193_s8 + $0x18] sm:$0xff] }
  0x13   : > { %v209_v14 = vadd.f32 %v208_v12, %v207_v11  ;;  %v212_v18 = vsel %vm206_vm0, %v205_v16, 0.0 }
  0x14   : > { %299 = vperm.xlu1 %432, %v281_v7   ;;  %294 = vperm.xlu0 %431, %v280_v8  }
  0x15   : > { %v211_v17 = vadd.f32 %v210_v15, %v209_v14 }
  0x17   : > { %v213_v19 = vadd.f32 %v212_v18, %v211_v17 }
  0x19   : > { %v214_v20 = vrot.slane %v213_v19, 4 }
  0x1b   : > { %v215_v21 = vadd.f32 %v214_v20, %v213_v19 }
  0x1d   : > { %v216_v22 = vrot.slane %v215_v21, 2 }
  0x1f   : > { %v217_v23 = vadd.f32 %v216_v22, %v215_v21 }
  0x21   : > { %v218_v24 = vrot.slane %v217_v23, 1 }
  0x23   : > { %v219_v25 = vadd.f32 %v218_v24, %v217_v23 }
  0x25   : > { %v221_v26 = vmul.f32 0.03125, %v219_v25 }
  0x27   : > { %v222_v27 = vsub.f32 %v202_v9, %v221_v26  ;;  %v223_v28 = vsub.f32 %v203_v10, %v221_v26  ;;  %v224_v29 = vsub.f32 %v204_v13, %v221_v26  ;;  %v225_v32 = vsub.f32 %v205_v16, %v221_v26 }
  0x29   : > { %v226_v30 = vmul.f32 %v222_v27, %v222_v27  ;;  %v227_v31 = vmul.f32 %v223_v28, %v223_v28  ;;  %v228_v33 = vmul.f32 %v224_v29, %v224_v29  ;;  %v229_v37 = vmul.f32 %v225_v32, %v225_v32 }
  0x2b   : > { %v230_v34 = vsel %vm206_vm0, %v226_v30, 0.0  ;;  %v231_v35 = vsel %vm206_vm0, %v227_v31, 0.0  ;;  %v233_v38 = vsel %vm206_vm0, %v228_v33, 0.0  ;;  %v235_v40 = vsel %vm206_vm0, %v229_v37, 0.0 }
  0x2c   : > { %v232_v36 = vadd.f32 %v231_v35, %v230_v34 }
  0x2e   : > { %v234_v39 = vadd.f32 %v233_v38, %v232_v36 }
  0x30   : > { %v236_v41 = vadd.f32 %v235_v40, %v234_v39 }
  0x32   : > { %v237_v42 = vrot.slane %v236_v41, 4 }
  0x34   : > { %v238_v43 = vadd.f32 %v237_v42, %v236_v41 }
  0x36   : > { %v239_v44 = vrot.slane %v238_v43, 2 }
  0x38   : > { %v240_v45 = vadd.f32 %v239_v44, %v238_v43 }
  0x3a   : > { %v241_v46 = vrot.slane %v240_v45, 1 }
  0x3c   : > { %v242_v47 = vadd.f32 %v241_v46, %v240_v45 }
  0x3e   : > { %v243_v48 = vmul.f32 0.03125, %v242_v47 }
  0x40   : > { %v244_v49 = vadd.f32 1e-05, %v243_v48 }
  0x42   : > { %433 = vrsqrt.f32 %v244_v49 }
  0x4c   : > { %v434_v50 = vpop.eup %433 }
  0x4d   : > { %v246_v53 = vmul.f32 %v434_v50, %v222_v27  ;;  %v247_v54 = vmul.f32 %v434_v50, %v223_v28  ;;  %v248_v57 = vmul.f32 %v434_v50, %v224_v29  ;;  %v249_v59 = vmul.f32 %v434_v50, %v225_v32 }
  0x87   : > { %v267_v51 = vpop.permute.xlu1 %266  ;;  %v257_v52 = vpop.permute.xlu0 %256 }
  0x88   : > { %v274_v58 = vmul.f32 %v257_v52, %v246_v53  ;;  %v276_v1 = vmul.f32 %v267_v51, %v248_v57 }
  0x8b   : > { %v272_v55 = vpop.permute.xlu1 %271  ;;  %v262_v56 = vpop.permute.xlu0 %261 }
  0x8c   : > { %v275_v60 = vmul.f32 %v262_v56, %v247_v54  ;;  %v277_v2 = vmul.f32 %v272_v55, %v249_v59 }
  0x8f   : > { %v290_v61 = vpop.permute.xlu1 %289  ;;  %v285_v62 = vpop.permute.xlu0 %284 }
  0x90   : > { %v303_v63 = vadd.f32 %v290_v61, %v275_v60  ;;  %v302_v0 = vadd.f32 %v285_v62, %v274_v58 }
  0x92   : > { %307 = vst.msk [vmem:[%s201_s11 + $0x8] sm:$0xff] %vm206_vm0, %v303_v63  ;;  %306 = vst.msk [vmem:[%s201_s11] sm:$0xff] %vm206_vm0, %v302_v0 }
  0x93   : > { %v300_v3 = vpop.permute.xlu1 %299  ;;  %v295_v4 = vpop.permute.xlu0 %294 }
  0x94   : > { %v305_v5 = vadd.f32 %v300_v3, %v277_v2  ;;  %v304_v6 = vadd.f32 %v295_v4, %v276_v1 }
  0x96   : > { %309 = vst.msk [vmem:[%s201_s11 + $0x18] sm:$0xff] %vm206_vm0, %v305_v5  ;;  %308 = vst.msk [vmem:[%s201_s11 + $0x10] sm:$0xff] %vm206_vm0, %v304_v6 }
  0x97 PF: > { %s13_s14 = sadd.s32 1, %s457_s14   ;;  %s560_s12 = smov %s453_s13 }
  0x98   : > { %p10_p5 = scmp.ge.s32.totalorder %s13_s14, 4   ;;  %s561_s13 = smov %s563_s15 }
  0x9a   :  { %12 = sbr.rel (!%p10_p5) target bundleno = 2 (0x2), region = 62 }

</bundles_post_ra>
